<compile_context>
chip_gen: v6e
topology: v6e:2x2x1
jax: 0.10.0
libtpu: 0.0.40
codegen_flags: <defaults>
</compile_context>

<pallas_src>
import functools

import jax
import jax.numpy as jnp
from jax.experimental import pallas as pl
from jax.experimental.pallas import tpu as pltpu


def _round_up(n, m):
    return ((n + m - 1) // m) * m


def _fused_mlp_kernel(x_ref, w1_ref, b1_ref, w2_ref, b2_ref, w3_ref, b3_ref, o_ref):
    # Layer 1: (TB, 64) @ (64, 128) + (1, 128), ReLU. bf16 inputs, f32 accumulate.
    h1 = jnp.dot(x_ref[...], w1_ref[...], preferred_element_type=jnp.float32)
    h1 = jnp.maximum(h1 + b1_ref[...], 0.0)
    # Layer 2: (TB, 128) @ (128, 256) + (1, 256), ReLU.
    h2 = jnp.dot(h1.astype(jnp.bfloat16), w2_ref[...],
                 preferred_element_type=jnp.float32)
    h2 = jnp.maximum(h2 + b2_ref[...], 0.0)
    # Layer 3: (TB, 256) @ (256, out_pad) + (1, out_pad), ReLU. Lane-dense store.
    h3 = jnp.dot(h2.astype(jnp.bfloat16), w3_ref[...],
                 preferred_element_type=jnp.float32)
    o_ref[...] = jnp.maximum(h3 + b3_ref[...], 0.0).astype(o_ref.dtype)


@functools.partial(jax.jit, static_argnames=("tb",))
def inverse_base_forward(x, params, tb=512):
    """InverseBase forward pass as a single fused, batch-tiled Pallas TPU kernel.

    x: (B, architecture[0]) float32
    params: dict with w1,b1,w2,b2,w3,b3; weights stored (in, out), biases (1, out),
            i.e. y = x @ W + b (== PyTorch Linear with W.T).
    """
    w1, b1 = params["w1"], params["b1"]
    w2, b2 = params["w2"], params["b2"]
    w3, b3 = params["w3"], params["b3"]

    B, in_dim = x.shape
    h1_dim = w1.shape[1]
    h2_dim = w2.shape[1]
    out_dim = w3.shape[1]

    # --- Lane-dense output: pad layer-3 columns to a multiple of 128 lanes. ---
    out_pad = _round_up(out_dim, 128)
    if out_pad != out_dim:
        w3 = jnp.pad(w3, ((0, 0), (0, out_pad - out_dim)))
        b3 = jnp.pad(b3, ((0, 0), (0, out_pad - out_dim)))

    # --- Batch tile (multiple of 8); pad B so there is no ragged last block. ---
    TB = min(tb, _round_up(B, 8))
    B_pad = _round_up(B, TB)
    if B_pad != B:
        x = jnp.pad(x, ((0, B_pad - B), (0, 0)))

    # bf16 matmul operands, f32 biases / accumulation.
    xb = x.astype(jnp.bfloat16)
    w1b = w1.astype(jnp.bfloat16)
    w2b = w2.astype(jnp.bfloat16)
    w3b = w3.astype(jnp.bfloat16)
    b1f = b1.astype(jnp.float32)
    b2f = b2.astype(jnp.float32)
    b3f = b3.astype(jnp.float32)

    def resident(a):
        # Full-array block, same block for every grid step -> DMA'd once, VMEM-resident.
        nd = a.ndim
        return pl.BlockSpec(a.shape, lambda i, _nd=nd: (0,) * _nd)

    grid = (B_pad // TB,)

    flops = 2 * B_pad * (in_dim * h1_dim + h1_dim * h2_dim + h2_dim * out_pad)
    bytes_accessed = (
        xb.size * 2
        + (w1b.size + w2b.size + w3b.size) * 2
        + (b1f.size + b2f.size + b3f.size) * 4
        + B_pad * out_pad * 4
    )

    y = pl.pallas_call(
        _fused_mlp_kernel,
        out_shape=jax.ShapeDtypeStruct((B_pad, out_pad), jnp.float32),
        grid=grid,
        in_specs=[
            pl.BlockSpec((TB, in_dim), lambda i: (i, 0)),
            resident(w1b), resident(b1f),
            resident(w2b), resident(b2f),
            resident(w3b), resident(b3f),
        ],
        out_specs=pl.BlockSpec((TB, out_pad), lambda i: (i, 0)),
        compiler_params=pltpu.CompilerParams(
            dimension_semantics=("parallel",),
        ),
        cost_estimate=pl.CostEstimate(
            flops=int(flops), transcendentals=0, bytes_accessed=int(bytes_accessed)),
    )(xb, w1b, b1f, w2b, b2f, w3b, b3f)

    return y[:B, :out_dim]


def init_params(key, state_stack, input_dim, architecture=(64, 128, 256)):
    """Deterministic synthetic parameter init (PyTorch-like uniform fan-in scaling)."""
    dims = list(architecture) + [state_stack * input_dim]
    params = {}
    keys = jax.random.split(key, 2 * (len(dims) - 1))
    for i in range(len(dims) - 1):
        fan_in = dims[i]
        bound = 1.0 / (fan_in ** 0.5)
        w = jax.random.uniform(keys[2 * i], (dims[i], dims[i + 1]),
                               minval=-bound, maxval=bound, dtype=jnp.float32)
        b = jax.random.uniform(keys[2 * i + 1], (1, dims[i + 1]),
                               minval=-bound, maxval=bound, dtype=jnp.float32)
        params[f"w{i + 1}"] = w
        params[f"b{i + 1}"] = b
    return params


def reference_forward(x, params):
    """Reference mirroring the kernel's numerics (bf16 matmul operands, f32 accum)."""
    def lin_relu(h, w, b):
        y = jnp.dot(h.astype(jnp.bfloat16), w.astype(jnp.bfloat16),
                    preferred_element_type=jnp.float32)
        return jnp.maximum(y + b.astype(jnp.float32), 0.0)

    h = lin_relu(x, params["w1"], params["b1"])
    h = lin_relu(h, params["w2"], params["b2"])
    return lin_relu(h, params["w3"], params["b3"])


if __name__ == "__main__":
    # Small shapes consistent with the module defaults:
    # architecture=[64,128,256], state_stack=4, input_dim=16 -> out_dim = 64.
    state_stack, input_dim = 4, 16
    architecture = (64, 128, 256)
    out_dim = state_stack * input_dim

    key = jax.random.PRNGKey(0)
    kx, kp, kx2 = jax.random.split(key, 3)
    params = init_params(kp, state_stack, input_dim, architecture)

    # --- Small-shape run ---
    B = 8
    x = jax.random.normal(kx, (B, architecture[0]), dtype=jnp.float32)
    out = jax.block_until_ready(inverse_base_forward(x, params))
    ref = reference_forward(x, params)
    assert out.shape == (B, out_dim)
    assert jnp.allclose(out, ref, atol=1e-2, rtol=1e-2), "mismatch vs reference (small)"

    # --- Exercise the gridded / padded path (B not a multiple of the tile) ---
    B2 = 40
    x2 = jax.random.normal(kx2, (B2, architecture[0]), dtype=jnp.float32)
    out2 = jax.block_until_ready(inverse_base_forward(x2, params, tb=16))
    ref2 = reference_forward(x2, params)
    assert out2.shape == (B2, out_dim)
    assert jnp.allclose(out2, ref2, atol=1e-2, rtol=1e-2), "mismatch vs reference (tiled)"

    print("KERNEL_OK")
</pallas_src>

<mosaic_0001>
module attributes {stable_mosaic.version = 11 : i64} {
  func.func @_fused_mlp_kernel(%arg0: i32, %arg1: memref<8x64xbf16, #tpu.memory_space<vmem>>, %arg2: memref<64x128xbf16, #tpu.memory_space<vmem>>, %arg3: memref<1x128xf32, #tpu.memory_space<vmem>>, %arg4: memref<128x256xbf16, #tpu.memory_space<vmem>>, %arg5: memref<1x256xf32, #tpu.memory_space<vmem>>, %arg6: memref<256x128xbf16, #tpu.memory_space<vmem>>, %arg7: memref<1x128xf32, #tpu.memory_space<vmem>>, %arg8: memref<8x128xf32, #tpu.memory_space<vmem>>) attributes {dimension_semantics = [#tpu.dimension_semantics<parallel>], iteration_bounds = array<i64: 1>, scalar_prefetch = 0 : i64, scratch_operands = 0 : i64, tpu.core_type = #tpu.core_type<tc>, window_params = [{transform_indices = @transform_0, window_bounds = array<i64: 8, 64>}, {pipeline_mode = #tpu.pipeline_mode<synchronous>, transform_indices = @transform_1, window_bounds = array<i64: 64, 128>}, {pipeline_mode = #tpu.pipeline_mode<synchronous>, transform_indices = @transform_2, window_bounds = array<i64: 1, 128>}, {pipeline_mode = #tpu.pipeline_mode<synchronous>, transform_indices = @transform_3, window_bounds = array<i64: 128, 256>}, {pipeline_mode = #tpu.pipeline_mode<synchronous>, transform_indices = @transform_4, window_bounds = array<i64: 1, 256>}, {pipeline_mode = #tpu.pipeline_mode<synchronous>, transform_indices = @transform_5, window_bounds = array<i64: 256, 128>}, {pipeline_mode = #tpu.pipeline_mode<synchronous>, transform_indices = @transform_6, window_bounds = array<i64: 1, 128>}, {transform_indices = @transform_7, window_bounds = array<i64: 8, 128>}]} {
    %c0 = arith.constant 0 : index
    %c0_0 = arith.constant 0 : index
    %0 = vector.load %arg1[%c0, %c0_0] : memref<8x64xbf16, #tpu.memory_space<vmem>>, vector<8x64xbf16>
    %c0_1 = arith.constant 0 : index
    %c0_2 = arith.constant 0 : index
    %1 = vector.load %arg2[%c0_1, %c0_2] : memref<64x128xbf16, #tpu.memory_space<vmem>>, vector<64x128xbf16>
    %cst = arith.constant dense<0.000000e+00> : vector<8x128xf32>
    %2 = tpu.matmul %0, %1, %cst {dimension_numbers = #tpu.dot_dimension_numbers<[1], [0], [0], [1], [0, 0, 1, 1], [], []>} : vector<8x64xbf16>, vector<64x128xbf16>, vector<8x128xf32> -> vector<8x128xf32>
    %c0_3 = arith.constant 0 : index
    %c0_4 = arith.constant 0 : index
    %3 = vector.load %arg3[%c0_3, %c0_4] : memref<1x128xf32, #tpu.memory_space<vmem>>, vector<1x128xf32>
    %4 = vector.broadcast %3 : vector<1x128xf32> to vector<8x128xf32>
    %5 = arith.addf %2, %4 : vector<8x128xf32>
    %cst_5 = arith.constant 0.000000e+00 : f32
    %6 = vector.broadcast %cst_5 : f32 to vector<8x128xf32>
    %7 = arith.maximumf %5, %6 : vector<8x128xf32>
    %8 = arith.truncf %7 : vector<8x128xf32> to vector<8x128xbf16>
    %c0_6 = arith.constant 0 : index
    %c0_7 = arith.constant 0 : index
    %9 = vector.load %arg4[%c0_6, %c0_7] : memref<128x256xbf16, #tpu.memory_space<vmem>>, vector<128x256xbf16>
    %cst_8 = arith.constant dense<0.000000e+00> : vector<8x256xf32>
    %10 = tpu.matmul %8, %9, %cst_8 {dimension_numbers = #tpu.dot_dimension_numbers<[1], [0], [0], [1], [0, 0, 1, 1], [], []>} : vector<8x128xbf16>, vector<128x256xbf16>, vector<8x256xf32> -> vector<8x256xf32>
    %c0_9 = arith.constant 0 : index
    %c0_10 = arith.constant 0 : index
    %11 = vector.load %arg5[%c0_9, %c0_10] : memref<1x256xf32, #tpu.memory_space<vmem>>, vector<1x256xf32>
    %12 = vector.broadcast %11 : vector<1x256xf32> to vector<8x256xf32>
    %13 = arith.addf %10, %12 : vector<8x256xf32>
    %cst_11 = arith.constant 0.000000e+00 : f32
    %14 = vector.broadcast %cst_11 : f32 to vector<8x256xf32>
    %15 = arith.maximumf %13, %14 : vector<8x256xf32>
    %16 = arith.truncf %15 : vector<8x256xf32> to vector<8x256xbf16>
    %c0_12 = arith.constant 0 : index
    %c0_13 = arith.constant 0 : index
    %17 = vector.load %arg6[%c0_12, %c0_13] : memref<256x128xbf16, #tpu.memory_space<vmem>>, vector<256x128xbf16>
    %cst_14 = arith.constant dense<0.000000e+00> : vector<8x128xf32>
    %18 = tpu.matmul %16, %17, %cst_14 {dimension_numbers = #tpu.dot_dimension_numbers<[1], [0], [0], [1], [0, 0, 1, 1], [], []>} : vector<8x256xbf16>, vector<256x128xbf16>, vector<8x128xf32> -> vector<8x128xf32>
    %c0_15 = arith.constant 0 : index
    %c0_16 = arith.constant 0 : index
    %19 = vector.load %arg7[%c0_15, %c0_16] : memref<1x128xf32, #tpu.memory_space<vmem>>, vector<1x128xf32>
    %20 = vector.broadcast %19 : vector<1x128xf32> to vector<8x128xf32>
    %21 = arith.addf %18, %20 : vector<8x128xf32>
    %cst_17 = arith.constant 0.000000e+00 : f32
    %22 = vector.broadcast %cst_17 : f32 to vector<8x128xf32>
    %23 = arith.maximumf %21, %22 : vector<8x128xf32>
    %c0_18 = arith.constant 0 : index
    %c0_19 = arith.constant 0 : index
    %24 = vector.load %arg8[%c0_18, %c0_19] : memref<8x128xf32, #tpu.memory_space<vmem>>, vector<8x128xf32>
    tpu.vector_store %arg8[%c0_18, %c0_19], %23 {strides = array<i32>} : memref<8x128xf32, #tpu.memory_space<vmem>>, vector<8x128xf32>,
    return
  }
  func.func @transform_0(%arg0: i32) -> (i32, i32) {
    %c0_i32 = arith.constant 0 : i32
    %c0_i32_0 = arith.constant 0 : i32
    return %arg0, %c0_i32 : i32, i32
  }
  func.func @transform_1(%arg0: i32) -> (i32, i32) {
    %c0_i32 = arith.constant 0 : i32
    %c0_i32_0 = arith.constant 0 : i32
    %c0_i32_1 = arith.constant 0 : i32
    return %c0_i32, %c0_i32_0 : i32, i32
  }
  func.func @transform_2(%arg0: i32) -> (i32, i32) {
    %c0_i32 = arith.constant 0 : i32
    %c0_i32_0 = arith.constant 0 : i32
    %c0_i32_1 = arith.constant 0 : i32
    return %c0_i32, %c0_i32_0 : i32, i32
  }
  func.func @transform_3(%arg0: i32) -> (i32, i32) {
    %c0_i32 = arith.constant 0 : i32
    %c0_i32_0 = arith.constant 0 : i32
    %c0_i32_1 = arith.constant 0 : i32
    return %c0_i32, %c0_i32_0 : i32, i32
  }
  func.func @transform_4(%arg0: i32) -> (i32, i32) {
    %c0_i32 = arith.constant 0 : i32
    %c0_i32_0 = arith.constant 0 : i32
    %c0_i32_1 = arith.constant 0 : i32
    return %c0_i32, %c0_i32_0 : i32, i32
  }
  func.func @transform_5(%arg0: i32) -> (i32, i32) {
    %c0_i32 = arith.constant 0 : i32
    %c0_i32_0 = arith.constant 0 : i32
    %c0_i32_1 = arith.constant 0 : i32
    return %c0_i32, %c0_i32_0 : i32, i32
  }
  func.func @transform_6(%arg0: i32) -> (i32, i32) {
    %c0_i32 = arith.constant 0 : i32
    %c0_i32_0 = arith.constant 0 : i32
    %c0_i32_1 = arith.constant 0 : i32
    return %c0_i32, %c0_i32_0 : i32, i32
  }
  func.func @transform_7(%arg0: i32) -> (i32, i32) {
    %c0_i32 = arith.constant 0 : i32
    %c0_i32_0 = arith.constant 0 : i32
    return %arg0, %c0_i32 : i32, i32
  }
}

</mosaic_0001>

<bundles_post_ra>
// kernel: inverse_base_forward.1
= control target key start
LH: loop header
LB: loop body
LE: loop exit
PB: predicated region body
PF: predicated region fallthrough
CT: control target
= control target key end

     0   :  { %v606_v1 = vmov 0.0   ;;  %vm607_vm0 = vmmov 0   ;;  %vm68_vm1 = vcmask 523264   ;;  %s773_s0 = inlined_call_operand.vmem [shape: bf16[8,64], index: 0, kind: input, shape index: {}]   ;;  %s774_s1 = inlined_call_operand.vmem [shape: bf16[64,128], index: 1, kind: input, shape index: {}]   ;;  %s775_s2 = inlined_call_operand.vmem [shape: f32[1,128], index: 2, kind: input, shape index: {}]   ;;  %s776_s3 = inlined_call_operand.vmem [shape: bf16[128,256], index: 3, kind: input, shape index: {}]   ;;  %s777_s4 = inlined_call_operand.vmem [shape: f32[1,256], index: 4, kind: input, shape index: {}]   ;;  %s778_s5 = inlined_call_operand.vmem [shape: bf16[256,128], index: 5, kind: input, shape index: {}]   ;;  %s779_s6 = inlined_call_operand.vmem [shape: f32[1,128], index: 6, kind: input, shape index: {}]   ;;  %s780_s7 = inlined_call_operand.hbm [shape: f32[8,128], index: 7, kind: output, shape index: {}]  }
   0x1   :  { %v540_v0 = vld [vmem:[%s774_s1 + $0x18] sm:$0xff]   ;;  %524 = vmatprep.subr.bf16.mxu0 %v606_v1  ;;  %v541_v2 = vld [vmem:[%s774_s1 + $0x10] sm:$0xff]   ;;  %532 = vmatprep.mubr.msk.bf16.mxu0 %vm607_vm0, %v606_v1  ;;  %v542_v5 = vld [vmem:[%s774_s1 + $0x8] sm:$0xff]  }
   0x2   :  { %525 = vmatpush3.bf16.msra.mxu0 %v540_v0  ;;  %v544_v3 = vld [vmem:[%s776_s3 + $0x74] ss:$8 sps:$4 sm:$0xff]   ;;  %v546_v4 = vld [vmem:[%s776_s3 + $0x70] ss:$8 sps:$4 sm:$0xff]   ;;  %v547_v6 = vld [vmem:[%s776_s3 + $0x64] ss:$8 sps:$4 sm:$0xff]  }
   0x3   :  { %526 = vmatprep.subr.bf16.mxu0 %v606_v1  ;;  %222 = vmatprep.subr.bf16.mxu1 %v544_v3  ;;  %v549_v7 = vld [vmem:[%s776_s3 + $0x60] ss:$8 sps:$4 sm:$0xff]   ;;  %v550_v8 = vld [vmem:[%s776_s3 + $0x54] ss:$8 sps:$4 sm:$0xff]   ;;  %v552_v10 = vld [vmem:[%s776_s3 + $0x50] ss:$8 sps:$4 sm:$0xff]  }
   0x4   :  { %223 = vmatpush1.bf16.msra.mxu1 %v546_v4  ;;  %v543_v9 = vld [vmem:[%s774_s1] sm:$0xff]   ;;  %v556_v14 = vld [vmem:[%s776_s3 + $0x34] ss:$8 sps:$4 sm:$0xff]   ;;  %v558_v15 = vld [vmem:[%s776_s3 + $0x30] ss:$8 sps:$4 sm:$0xff]  }
   0x5   :  { %224 = vmatprep.subr.bf16.mxu1 %v547_v6  ;;  %v28_v11 = vld [vmem:[%s773_s0] sm:$0xf]  ;;  %v553_v12 = vld [vmem:[%s776_s3 + $0x44] ss:$8 sps:$4 sm:$0xff]   ;;  %v562_v18 = vld [vmem:[%s776_s3 + $0x14] ss:$8 sps:$4 sm:$0xff]  }
   0x6   :  { %527 = vmatpush3.bf16.msra.mxu0 %v541_v2  ;;  %v555_v13 = vld [vmem:[%s776_s3 + $0x40] ss:$8 sps:$4 sm:$0xff]   ;;  %v559_v16 = vld [vmem:[%s776_s3 + $0x24] ss:$8 sps:$4 sm:$0xff]  }
   0x7   :  { %528 = vmatprep.subr.bf16.mxu0 %v606_v1  ;;  %v561_v17 = vld [vmem:[%s776_s3 + $0x20] ss:$8 sps:$4 sm:$0xff]  }
   0x8   :  { %225 = vmatpush1.bf16.msra.mxu1 %v549_v7 }
   0x9   :  { %226 = vmatprep.subr.bf16.mxu1 %v550_v8 }
   0xa   :  { %529 = vmatpush3.bf16.msra.mxu0 %v542_v5 }
   0xb   :  { %530 = vmatprep.subr.bf16.mxu0 %v606_v1 }
   0xc   :  { %227 = vmatpush1.bf16.msra.mxu1 %v552_v10 }
   0xd   :  { %228 = vmatprep.subr.bf16.mxu1 %v553_v12 }
   0xe   :  { %531 = vmatpush3.bf16.msra.mxu0 %v543_v9 }
  0x10   :  { %229 = vmatpush1.bf16.msra.mxu1 %v555_v13 }
  0x11   :  { %533 = vmatmul.mubr.msk.bf16.vlgmr.msra.gmra.mxu0 %vm68_vm1, %v28_v11  ;;  %230 = vmatprep.subr.bf16.mxu1 %v556_v14 }
  0x14   :  { %231 = vmatpush1.bf16.msra.mxu1 %v558_v15 }
  0x15   :  { %232 = vmatprep.subr.bf16.mxu1 %v559_v16 }
  0x16   :  { %12 = vsyncpa [#allocation3], 0  ;;  %v564_v19 = vld [vmem:[%s776_s3 + $0x10] ss:$8 sps:$4 sm:$0xff]   ;;  %v565_v20 = vld [vmem:[%s776_s3 + $0x4] ss:$8 sps:$4 sm:$0xff]   ;;  %v132_v47 = vlaneseq }
  0x17   :  { %v567_v21 = vld [vmem:[%s776_s3] ss:$8 sps:$4 sm:$0xff]   ;;  %v608_v22 = vmov 0   ;;  %v568_v23 = vld [vmem:[%s778_s5 + $0x78] sm:$0xff]   ;;  %v570_v25 = vld [vmem:[%s778_s5 + $0x70] sm:$0xff]  }
  0x18   :  { %233 = vmatpush1.bf16.msra.mxu1 %v561_v17  ;;  %254 = vmatprep.mubr.bf16.mxu1 %v608_v22  ;;  %v569_v24 = vld [vmem:[%s778_s5 + $0x38] sm:$0xff]   ;;  %v571_v26 = vld [vmem:[%s778_s5 + $0x30] sm:$0xff]   ;;  %v572_v27 = vld [vmem:[%s778_s5 + $0x68] sm:$0xff]   ;;  %v133_v48 = vshrl.u32 %v132_v47, 7 }
  0x19   :  { %234 = vmatprep.subr.bf16.mxu1 %v562_v18  ;;  %502 = vmatprep.subr.bf16.mxu0 %v568_v23  ;;  %v573_v28 = vld [vmem:[%s778_s5 + $0x28] sm:$0xff]   ;;  %v574_v29 = vld [vmem:[%s778_s5 + $0x60] sm:$0xff]   ;;  %v576_v31 = vld [vmem:[%s778_s5 + $0x58] sm:$0xff]  }
  0x1a   :  { %503 = vmatpush3.bf16.msra.mxu0 %v569_v24  ;;  %v575_v30 = vld [vmem:[%s778_s5 + $0x20] sm:$0xff]   ;;  %v577_v32 = vld [vmem:[%s778_s5 + $0x18] sm:$0xff]   ;;  %v578_v33 = vld [vmem:[%s778_s5 + $0x50] sm:$0xff]   ;;  %v134_v49 = vsub.s32 0, %v133_v48  ;;  %v138_v51 = vsub.s32 1, %v133_v48 }
  0x1b   :  { %504 = vmatprep.subr.bf16.mxu0 %v570_v25  ;;  %v579_v34 = vld [vmem:[%s778_s5 + $0x10] sm:$0xff]   ;;  %v458_v35 = vld [vmem:[%s775_s2] ss:$0 sm:$0xff]  ;;  %v580_v43 = vld [vmem:[%s778_s5 + $0x48] sm:$0xff]  }
  0x1c   :  { %235 = vmatpush1.bf16.msra.mxu1 %v564_v19  ;;  %v581_v44 = vld [vmem:[%s778_s5 + $0x8] sm:$0xff]   ;;  %v582_v45 = vld [vmem:[%s778_s5 + $0x40] sm:$0xff]  }
  0x1d   :  { %236 = vmatprep.subr.bf16.mxu1 %v565_v20  ;;  %v583_v46 = vld [vmem:[%s778_s5] sm:$0xff]  }
  0x1e   :  { %505 = vmatpush3.bf16.msra.mxu0 %v571_v26  ;;  %v130_v50 = vld [vmem:[%s777_s4] sm:$0x3]  ;;  %s609_s4 = smov [#allocation2]  }
  0x1f   :  { %506 = vmatprep.subr.bf16.mxu0 %v572_v27  ;;  %v135_v52 = vrot.slane %v130_v50, %v134_v49  ;;  %v139_v53 = vrot.slane %v130_v50, %v138_v51  ;;  %v480_v1 = vld [vmem:[%s779_s6] ss:$0 sm:$0xff]  ;;  %s450_s1 = sshll.u32 %s609_s4, 4  ;;  %s451_s1 = int_to_ptr.vmem [resolvable:$true] %s450_s1 }
  0x20   :  { %237 = vmatpush1.bf16.msra.mxu1 %v567_v21  ;;  %s584_s27 = scalar_lea.vmem %s451_s1, 128  ;;  %p589_p1 = scmp.lt.s32.totalorder %s451_s1, %s451_s1 }
  0x21   :  { %p585_p0 = scmp.ne.s32.totalorder %s451_s1, %s584_s27  ;;  %p590_p2 = scmp.lt.s32.totalorder %s584_s27, %s584_s27 }
  0x22   :  { %507 = vmatpush3.bf16.msra.mxu0 %v573_v28 }
  0x23   :  { %508 = vmatprep.subr.bf16.mxu0 %v574_v29  ;;  %p591_p3 = por %p590_p2, %p589_p1 }
  0x25   :  { %p592_p4 = pnand %p591_p3, %p585_p0 }
  0x26   :  { %509 = vmatpush3.bf16.msra.mxu0 %v575_v30 }
  0x27   :  { %510 = vmatprep.subr.bf16.mxu0 %v576_v31 }
  0x2a   :  { %511 = vmatpush3.bf16.msra.mxu0 %v577_v32 }
  0x2b   :  { %512 = vmatprep.subr.bf16.mxu0 %v578_v33 }
  0x2e   :  { %513 = vmatpush3.bf16.msra.mxu0 %v579_v34 }
  0x2f   :  { %514 = vmatprep.subr.bf16.mxu0 %v580_v43 }
  0x32   :  { %515 = vmatpush3.bf16.msra.mxu0 %v581_v44 }
  0x33   :  { %516 = vmatprep.subr.bf16.mxu0 %v582_v45 }
  0x36   :  { %517 = vmatpush3.bf16.msra.mxu0 %v583_v46 }
  0xd1   :  { %v106_v36 = vpop.f32.mrf.mxu0 }
  0xd2   :  { %v107_v37 = vadd.f32 %v458_v35, %v106_v36 }
  0xd3   :  { %v534_v38 = vpop.f32.mrf.mxu0 }
  0xd4   :  { %v112_v39 = vmax.f32 %v107_v37, 0.0 }
  0xd5   :  { %v109_v40 = vpop.f32.mrf.mxu0 }
  0xd6   :  { %v113_v41 = vpack.c.bf16 %v112_v39, %v112_v39 }
  0xd7   :  { %v535_v42 = vpop.f32.mrf.mxu0 }
  0xd8   :  { %255 = vmatmul.mubr.bf16.vlgmr.msra.gmra.mxu1 %v113_v41 }
 0x198   :  { %v256_v54 = vpop.f32.mrf.mxu1 }
 0x199   :  { %v257_v55 = vadd.f32 %v256_v54, %v135_v52 }
 0x19a   :  { %v258_v56 = vpop.f32.mrf.mxu1 }
 0x19b   :  { %v259_v57 = vadd.f32 %v258_v56, %v139_v53  ;;  %v263_v58 = vmax.f32 %v257_v55, 0.0 }
 0x19c   :  { %v260_v59 = vpop.f32.mrf.mxu1 }
 0x19d   :  { %v264_v60 = vmax.f32 %v259_v57, 0.0  ;;  %v265_v63 = vpack.c.bf16 %v263_v58, %v263_v58 }
 0x19e   :  { %v261_v61 = vpop.f32.mrf.mxu1 }
 0x19f   :  { %v266_v62 = vpack.c.bf16 %v264_v60, %v264_v60 }
 0x1a1   :  { %434 = vmatprep.mubr.bf16.mxu0 %v266_v62 }
 0x1a2   :  { %435 = vmatmul.mubr.bf16.vlgmr.msra.gmra.mxu0 %v265_v63 }
 0x262   :  { %v518_v0 = vpop.f32.mrf.mxu0 }
 0x264   :  { %v519_v2 = vpop.f32.mrf.mxu0 }
 0x265   :  { %v520_v3 = vadd.f32 %v519_v2, %v518_v0 }
 0x266   :  { %v521_v4 = vpop.f32.mrf.mxu0 }
 0x267   :  { %v437_v5 = vadd.f32 %v520_v3, %v480_v1 }
 0x268   :  { %v522_v6 = vpop.f32.mrf.mxu0 }
 0x269   :  { %v442_v7 = vmax.f32 %v437_v5, 0.0 }
 0x26b   :  { %443 = vst [vmem:[#allocation2] sm:$0xff] %v442_v7 }
 0x26c   :  { %595 = shalt.err (!%p592_p4)
}
 0x26d   :  { %453 = dma.vmem_to_hbm [thread:$0]  %s451_s1, 128, %s780_s7, [#allocation3]  }
 0x26e   :  { %604 = dma.done.wait [#allocation3], 128  }
 0x26f   :  { %605 = vsyncadd [#allocation3], 4294967168 }
 0x270   :  { %457 = vsyncpa [#allocation3], 1 }

</bundles_post_ra>
